<compile_context>
chip_gen: v7x
topology: tpu7x:2x2x1
jax: 0.10.0
libtpu: 0.0.40
codegen_flags: <defaults>
</compile_context>

<pallas_src>
import math

import jax
import jax.numpy as jnp
import numpy as np
from jax.experimental import pallas as pl
from jax.experimental.pallas import tpu as pltpu

# ----- problem sizes (small, consistent with the module) --------------------
B = 2            # batch
N = 8            # sequence length (tokens)
EMB = 32         # embedding size
NUM_HEADS = 4
HEAD_DIM = EMB // NUM_HEADS
DROPOUT = 0.0    # eval mode
OUT_PAD = 128    # lane-dense padded output width (>= EMB, multiple of 128)


def _mha_kernel(x_ref, wqkv_ref, bqkv_ref, wo_ref, bo_ref, out_ref):
    """Single grid step over the whole (flattened) problem.

    x_ref    : (B*N, EMB)      VMEM
    wqkv_ref : (EMB, 3*EMB)    VMEM  (Wq|Wk|Wv, in x out; scale folded into Wq)
    bqkv_ref : (1, 3*EMB)      VMEM
    wo_ref   : (EMB, OUT_PAD)  VMEM  (zero-padded beyond EMB columns)
    bo_ref   : (1, OUT_PAD)    VMEM
    out_ref  : (B*N, OUT_PAD)  VMEM  (only [:, :EMB] is meaningful)
    """
    x = x_ref[...]                                                 # (B*N, E)

    # Fused Q/K/V projection: one MXU matmul instead of three.
    qkv = jnp.dot(x, wqkv_ref[...],
                  preferred_element_type=jnp.float32) + bqkv_ref[...]  # (B*N, 3E)
    # Leading-dim split only (sublane-tile aligned): (B*N, 3E) -> (B, N, 3E).
    qkv3 = qkv.reshape(B, N, 3 * EMB)

    wo = wo_ref[...]                                               # (E, OUT_PAD)
    acc = jnp.zeros((B * N, OUT_PAD), jnp.float32)

    for h in range(NUM_HEADS):                                     # static, tiny
        lo = h * HEAD_DIM
        q_h = qkv3[:, :, lo:lo + HEAD_DIM]                         # (B, N, D)
        k_h = qkv3[:, :, EMB + lo:EMB + lo + HEAD_DIM]             # (B, N, D)
        v_h = qkv3[:, :, 2 * EMB + lo:2 * EMB + lo + HEAD_DIM]     # (B, N, D)

        # Batched over B, contracting the last dims -> no transpose needed.
        e = jnp.einsum("bqd,bkd->bqk", q_h, k_h,
                       preferred_element_type=jnp.float32)         # (B, N, N)

        # softmax; 1/sqrt(EMB) scale was pre-folded into Wq/bq.
        m = jnp.max(e, axis=-1, keepdims=True)
        p = jnp.exp(e - m)
        s = jnp.sum(p, axis=-1, keepdims=True)
        att = p * pl.reciprocal(s, approx=True)                    # EUP reciprocal
        # att_drop: identity in eval / dropout=0.0

        o_h = jnp.einsum("bqk,bkd->bqd", att, v_h,
                         preferred_element_type=jnp.float32)       # (B, N, D)

        # Fused head-merge + output projection: accumulate this head's output
        # through the matching rows of Wo (no concatenate / merge slab).
        acc = acc + jnp.dot(o_h.reshape(B * N, HEAD_DIM),
                            wo[lo:lo + HEAD_DIM, :],
                            preferred_element_type=jnp.float32)    # (B*N, OUT_PAD)

    out_ref[...] = (acc + bo_ref[...]).astype(out_ref.dtype)       # lane-dense store


def multi_head_attention(x, params):
    """x: (B, N, EMB) float32.  params: dict of weights (torch layout)."""
    # The module scales by emb_size ** 0.5 (NOT head_dim) -- preserved here.
    scale = 1.0 / math.sqrt(EMB)

    # nn.Linear weights are (out, in); transpose to (in, out).  Fold the
    # softmax scaling into the Q projection so the kernel never rescales.
    wq = params["wq"].T * scale
    wk = params["wk"].T
    wv = params["wv"].T
    bq = params["bq"] * scale
    bk = params["bk"]
    bv = params["bv"]

    w_qkv = jnp.concatenate([wq, wk, wv], axis=1)                  # (E, 3E)
    b_qkv = jnp.concatenate([bq, bk, bv]).reshape(1, 3 * EMB)      # (1, 3E)

    # Zero-pad the output projection to 128 lanes -> unmasked lane-dense
    # stores in the kernel; pad columns are sliced off below (free).
    wo_pad = jnp.zeros((EMB, OUT_PAD), jnp.float32).at[:, :EMB].set(params["wo"].T)
    bo_pad = jnp.zeros((1, OUT_PAD), jnp.float32).at[:, :EMB].set(params["bo"])

    x_flat = x.reshape(B * N, EMB)

    out_flat = pl.pallas_call(
        _mha_kernel,
        out_shape=jax.ShapeDtypeStruct((B * N, OUT_PAD), jnp.float32),
        grid_spec=pltpu.PrefetchScalarGridSpec(
            num_scalar_prefetch=0,
            grid=(1,),                                   # single step
            in_specs=[
                pl.BlockSpec((B * N, EMB), lambda i: (0, 0)),
                pl.BlockSpec((EMB, 3 * EMB), lambda i: (0, 0)),
                pl.BlockSpec((1, 3 * EMB), lambda i: (0, 0)),
                pl.BlockSpec((EMB, OUT_PAD), lambda i: (0, 0)),
                pl.BlockSpec((1, OUT_PAD), lambda i: (0, 0)),
            ],
            out_specs=pl.BlockSpec((B * N, OUT_PAD), lambda i: (0, 0)),
        ),
        compiler_params=pltpu.CompilerParams(
            # Single overhead-dominated step: keep it on one TensorCore
            # instead of paying megacore coordination for ~zero work.
            dimension_semantics=("arbitrary",)),
    )(x_flat, w_qkv, b_qkv, wo_pad, bo_pad)

    return out_flat[:, :EMB].reshape(B, N, EMB)


def _reference(x, params):
    """Pure-JAX reference replicating the PyTorch forward."""
    def lin(t, w, b):
        return t @ w.T + b
    q = lin(x, params["wq"], params["bq"])
    k = lin(x, params["wk"], params["bk"])
    v = lin(x, params["wv"], params["bv"])

    def split(t):  # 'b n (h d) -> b h n d'
        return t.reshape(B, N, NUM_HEADS, HEAD_DIM).transpose(0, 2, 1, 3)

    q, k, v = split(q), split(k), split(v)
    energy = jnp.einsum("bhqd,bhkd->bhqk", q, k)
    att = jax.nn.softmax(energy / (EMB ** 0.5), axis=-1)
    out = jnp.einsum("bhal,bhlv->bhav", att, v)
    out = out.transpose(0, 2, 1, 3).reshape(B, N, EMB)   # 'b h n d -> b n (h d)'
    return lin(out, params["wo"], params["bo"])


def _init_params(key):
    """Deterministic init; same shapes as the nn.Linear layers in __init__."""
    keys = jax.random.split(key, 8)
    bound = 1.0 / np.sqrt(EMB)

    def u(k, shape):
        return jax.random.uniform(k, shape, jnp.float32, -bound, bound)

    return {
        "wq": u(keys[0], (EMB, EMB)), "bq": u(keys[1], (EMB,)),
        "wk": u(keys[2], (EMB, EMB)), "bk": u(keys[3], (EMB,)),
        "wv": u(keys[4], (EMB, EMB)), "bv": u(keys[5], (EMB,)),
        "wo": u(keys[6], (EMB, EMB)), "bo": u(keys[7], (EMB,)),
    }


if __name__ == "__main__":
    key = jax.random.PRNGKey(0)
    k_x, k_p = jax.random.split(key)

    x = jax.random.normal(k_x, (B, N, EMB), jnp.float32)
    params = _init_params(k_p)

    out = multi_head_attention(x, params)
    out = jax.block_until_ready(out)

    ref = _reference(x, params)
    # Tolerance accounts for the EUP approximate reciprocal used for the
    # softmax normalization (pl.reciprocal(..., approx=True)); with
    # approx=False the kernel matches the reference to ~1e-6.
    np.testing.assert_allclose(np.asarray(out), np.asarray(ref),
                               rtol=2e-3, atol=2e-3)
    print("KERNEL_OK")
</pallas_src>

<mosaic_0001>
module attributes {stable_mosaic.version = 11 : i64} {
  func.func @_mha_kernel(%arg0: i32, %arg1: memref<16x32xf32, #tpu.memory_space<vmem>>, %arg2: memref<32x96xf32, #tpu.memory_space<vmem>>, %arg3: memref<1x96xf32, #tpu.memory_space<vmem>>, %arg4: memref<32x128xf32, #tpu.memory_space<vmem>>, %arg5: memref<1x128xf32, #tpu.memory_space<vmem>>, %arg6: memref<16x128xf32, #tpu.memory_space<vmem>>) attributes {dimension_semantics = [#tpu.dimension_semantics<arbitrary>], iteration_bounds = array<i64: 1>, scalar_prefetch = 0 : i64, scratch_operands = 0 : i64, tpu.core_type = #tpu.core_type<tc>, window_params = [{pipeline_mode = #tpu.pipeline_mode<synchronous>, transform_indices = @transform_0, window_bounds = array<i64: 16, 32>}, {pipeline_mode = #tpu.pipeline_mode<synchronous>, transform_indices = @transform_1, window_bounds = array<i64: 32, 96>}, {pipeline_mode = #tpu.pipeline_mode<synchronous>, transform_indices = @transform_2, window_bounds = array<i64: 1, 96>}, {pipeline_mode = #tpu.pipeline_mode<synchronous>, transform_indices = @transform_3, window_bounds = array<i64: 32, 128>}, {pipeline_mode = #tpu.pipeline_mode<synchronous>, transform_indices = @transform_4, window_bounds = array<i64: 1, 128>}, {pipeline_mode = #tpu.pipeline_mode<synchronous>, transform_indices = @transform_5, window_bounds = array<i64: 16, 128>}]} {
    %c0 = arith.constant 0 : index
    %c0_0 = arith.constant 0 : index
    %0 = vector.load %arg1[%c0, %c0_0] : memref<16x32xf32, #tpu.memory_space<vmem>>, vector<16x32xf32>
    %c0_1 = arith.constant 0 : index
    %c0_2 = arith.constant 0 : index
    %1 = vector.load %arg2[%c0_1, %c0_2] : memref<32x96xf32, #tpu.memory_space<vmem>>, vector<32x96xf32>
    %cst = arith.constant dense<0.000000e+00> : vector<16x96xf32>
    %2 = tpu.matmul %0, %1, %cst {dimension_numbers = #tpu.dot_dimension_numbers<[1], [0], [0], [1], [0, 0, 1, 1], [], []>} : vector<16x32xf32>, vector<32x96xf32>, vector<16x96xf32> -> vector<16x96xf32>
    %c0_3 = arith.constant 0 : index
    %c0_4 = arith.constant 0 : index
    %3 = vector.load %arg3[%c0_3, %c0_4] : memref<1x96xf32, #tpu.memory_space<vmem>>, vector<1x96xf32>
    %4 = vector.broadcast %3 : vector<1x96xf32> to vector<16x96xf32>
    %5 = arith.addf %2, %4 : vector<16x96xf32>
    %6 = vector.shape_cast %5 : vector<16x96xf32> to vector<2x8x96xf32>
    %c0_5 = arith.constant 0 : index
    %c0_6 = arith.constant 0 : index
    %7 = vector.load %arg4[%c0_5, %c0_6] : memref<32x128xf32, #tpu.memory_space<vmem>>, vector<32x128xf32>
    %cst_7 = arith.constant 0.000000e+00 : f32
    %8 = vector.broadcast %cst_7 : f32 to vector<16x128xf32>
    %9 = vector.extract_strided_slice %6 {offsets = [0, 0, 0], sizes = [2, 8, 8], strides = [1, 1, 1]} : vector<2x8x96xf32> to vector<2x8x8xf32>
    %10 = vector.extract_strided_slice %6 {offsets = [0, 0, 32], sizes = [2, 8, 8], strides = [1, 1, 1]} : vector<2x8x96xf32> to vector<2x8x8xf32>
    %11 = vector.extract_strided_slice %6 {offsets = [0, 0, 64], sizes = [2, 8, 8], strides = [1, 1, 1]} : vector<2x8x96xf32> to vector<2x8x8xf32>
    "tpu.trace_start"() <{level = 10 : i32, message = "bqd,bkd->bqk"}> : () -> ()
    %cst_8 = arith.constant dense<0.000000e+00> : vector<2x8x8xf32>
    %12 = tpu.matmul %9, %10, %cst_8 {dimension_numbers = #tpu.dot_dimension_numbers<[2], [2], [1], [1], [0, 0, 0, 1, 1, 1], [0], [0]>} : vector<2x8x8xf32>, vector<2x8x8xf32>, vector<2x8x8xf32> -> vector<2x8x8xf32>
    "tpu.trace_stop"() : () -> ()
    %cst_9 = arith.constant dense<0xFF800000> : vector<2x8xf32>
    %13 = vector.multi_reduction <maximumf>, %12, %cst_9 [2] : vector<2x8x8xf32> to vector<2x8xf32>
    %14 = vector.shape_cast %13 : vector<2x8xf32> to vector<2x8x1xf32>
    %15 = vector.broadcast %14 : vector<2x8x1xf32> to vector<2x8x8xf32>
    %16 = arith.subf %12, %15 : vector<2x8x8xf32>
    %17 = math.exp %16 : vector<2x8x8xf32>
    %cst_10 = arith.constant dense<0.000000e+00> : vector<2x8xf32>
    %18 = vector.multi_reduction <add>, %17, %cst_10 [2] : vector<2x8x8xf32> to vector<2x8xf32>
    %19 = vector.shape_cast %18 : vector<2x8xf32> to vector<2x8x1xf32>
    %20 = tpu.reciprocal %19 {approx = true} : vector<2x8x1xf32> -> vector<2x8x1xf32>
    %21 = vector.broadcast %20 : vector<2x8x1xf32> to vector<2x8x8xf32>
    %22 = arith.mulf %17, %21 : vector<2x8x8xf32>
    "tpu.trace_start"() <{level = 10 : i32, message = "bqk,bkd->bqd"}> : () -> ()
    %cst_11 = arith.constant dense<0.000000e+00> : vector<2x8x8xf32>
    %23 = tpu.matmul %22, %11, %cst_11 {dimension_numbers = #tpu.dot_dimension_numbers<[2], [1], [1], [2], [0, 0, 0, 1, 1, 2], [0], [0]>} : vector<2x8x8xf32>, vector<2x8x8xf32>, vector<2x8x8xf32> -> vector<2x8x8xf32>
    "tpu.trace_stop"() : () -> ()
    %24 = vector.shape_cast %23 : vector<2x8x8xf32> to vector<16x8xf32>
    %25 = vector.extract_strided_slice %7 {offsets = [0, 0], sizes = [8, 128], strides = [1, 1]} : vector<32x128xf32> to vector<8x128xf32>
    %cst_12 = arith.constant dense<0.000000e+00> : vector<16x128xf32>
    %26 = tpu.matmul %24, %25, %cst_12 {dimension_numbers = #tpu.dot_dimension_numbers<[1], [0], [0], [1], [0, 0, 1, 1], [], []>} : vector<16x8xf32>, vector<8x128xf32>, vector<16x128xf32> -> vector<16x128xf32>
    %27 = arith.addf %8, %26 : vector<16x128xf32>
    %28 = vector.extract_strided_slice %6 {offsets = [0, 0, 8], sizes = [2, 8, 8], strides = [1, 1, 1]} : vector<2x8x96xf32> to vector<2x8x8xf32>
    %29 = vector.extract_strided_slice %6 {offsets = [0, 0, 40], sizes = [2, 8, 8], strides = [1, 1, 1]} : vector<2x8x96xf32> to vector<2x8x8xf32>
    %30 = vector.extract_strided_slice %6 {offsets = [0, 0, 72], sizes = [2, 8, 8], strides = [1, 1, 1]} : vector<2x8x96xf32> to vector<2x8x8xf32>
    "tpu.trace_start"() <{level = 10 : i32, message = "bqd,bkd->bqk"}> : () -> ()
    %cst_13 = arith.constant dense<0.000000e+00> : vector<2x8x8xf32>
    %31 = tpu.matmul %28, %29, %cst_13 {dimension_numbers = #tpu.dot_dimension_numbers<[2], [2], [1], [1], [0, 0, 0, 1, 1, 1], [0], [0]>} : vector<2x8x8xf32>, vector<2x8x8xf32>, vector<2x8x8xf32> -> vector<2x8x8xf32>
    "tpu.trace_stop"() : () -> ()
    %cst_14 = arith.constant dense<0xFF800000> : vector<2x8xf32>
    %32 = vector.multi_reduction <maximumf>, %31, %cst_14 [2] : vector<2x8x8xf32> to vector<2x8xf32>
    %33 = vector.shape_cast %32 : vector<2x8xf32> to vector<2x8x1xf32>
    %34 = vector.broadcast %33 : vector<2x8x1xf32> to vector<2x8x8xf32>
    %35 = arith.subf %31, %34 : vector<2x8x8xf32>
    %36 = math.exp %35 : vector<2x8x8xf32>
    %cst_15 = arith.constant dense<0.000000e+00> : vector<2x8xf32>
    %37 = vector.multi_reduction <add>, %36, %cst_15 [2] : vector<2x8x8xf32> to vector<2x8xf32>
    %38 = vector.shape_cast %37 : vector<2x8xf32> to vector<2x8x1xf32>
    %39 = tpu.reciprocal %38 {approx = true} : vector<2x8x1xf32> -> vector<2x8x1xf32>
    %40 = vector.broadcast %39 : vector<2x8x1xf32> to vector<2x8x8xf32>
    %41 = arith.mulf %36, %40 : vector<2x8x8xf32>
    "tpu.trace_start"() <{level = 10 : i32, message = "bqk,bkd->bqd"}> : () -> ()
    %cst_16 = arith.constant dense<0.000000e+00> : vector<2x8x8xf32>
    %42 = tpu.matmul %41, %30, %cst_16 {dimension_numbers = #tpu.dot_dimension_numbers<[2], [1], [1], [2], [0, 0, 0, 1, 1, 2], [0], [0]>} : vector<2x8x8xf32>, vector<2x8x8xf32>, vector<2x8x8xf32> -> vector<2x8x8xf32>
    "tpu.trace_stop"() : () -> ()
    %43 = vector.shape_cast %42 : vector<2x8x8xf32> to vector<16x8xf32>
    %44 = vector.extract_strided_slice %7 {offsets = [8, 0], sizes = [8, 128], strides = [1, 1]} : vector<32x128xf32> to vector<8x128xf32>
    %cst_17 = arith.constant dense<0.000000e+00> : vector<16x128xf32>
    %45 = tpu.matmul %43, %44, %cst_17 {dimension_numbers = #tpu.dot_dimension_numbers<[1], [0], [0], [1], [0, 0, 1, 1], [], []>} : vector<16x8xf32>, vector<8x128xf32>, vector<16x128xf32> -> vector<16x128xf32>
    %46 = arith.addf %27, %45 : vector<16x128xf32>
    %47 = vector.extract_strided_slice %6 {offsets = [0, 0, 16], sizes = [2, 8, 8], strides = [1, 1, 1]} : vector<2x8x96xf32> to vector<2x8x8xf32>
    %48 = vector.extract_strided_slice %6 {offsets = [0, 0, 48], sizes = [2, 8, 8], strides = [1, 1, 1]} : vector<2x8x96xf32> to vector<2x8x8xf32>
    %49 = vector.extract_strided_slice %6 {offsets = [0, 0, 80], sizes = [2, 8, 8], strides = [1, 1, 1]} : vector<2x8x96xf32> to vector<2x8x8xf32>
    "tpu.trace_start"() <{level = 10 : i32, message = "bqd,bkd->bqk"}> : () -> ()
    %cst_18 = arith.constant dense<0.000000e+00> : vector<2x8x8xf32>
    %50 = tpu.matmul %47, %48, %cst_18 {dimension_numbers = #tpu.dot_dimension_numbers<[2], [2], [1], [1], [0, 0, 0, 1, 1, 1], [0], [0]>} : vector<2x8x8xf32>, vector<2x8x8xf32>, vector<2x8x8xf32> -> vector<2x8x8xf32>
    "tpu.trace_stop"() : () -> ()
    %cst_19 = arith.constant dense<0xFF800000> : vector<2x8xf32>
    %51 = vector.multi_reduction <maximumf>, %50, %cst_19 [2] : vector<2x8x8xf32> to vector<2x8xf32>
    %52 = vector.shape_cast %51 : vector<2x8xf32> to vector<2x8x1xf32>
    %53 = vector.broadcast %52 : vector<2x8x1xf32> to vector<2x8x8xf32>
    %54 = arith.subf %50, %53 : vector<2x8x8xf32>
    %55 = math.exp %54 : vector<2x8x8xf32>
    %cst_20 = arith.constant dense<0.000000e+00> : vector<2x8xf32>
    %56 = vector.multi_reduction <add>, %55, %cst_20 [2] : vector<2x8x8xf32> to vector<2x8xf32>
    %57 = vector.shape_cast %56 : vector<2x8xf32> to vector<2x8x1xf32>
    %58 = tpu.reciprocal %57 {approx = true} : vector<2x8x1xf32> -> vector<2x8x1xf32>
    %59 = vector.broadcast %58 : vector<2x8x1xf32> to vector<2x8x8xf32>
    %60 = arith.mulf %55, %59 : vector<2x8x8xf32>
    "tpu.trace_start"() <{level = 10 : i32, message = "bqk,bkd->bqd"}> : () -> ()
    %cst_21 = arith.constant dense<0.000000e+00> : vector<2x8x8xf32>
    %61 = tpu.matmul %60, %49, %cst_21 {dimension_numbers = #tpu.dot_dimension_numbers<[2], [1], [1], [2], [0, 0, 0, 1, 1, 2], [0], [0]>} : vector<2x8x8xf32>, vector<2x8x8xf32>, vector<2x8x8xf32> -> vector<2x8x8xf32>
    "tpu.trace_stop"() : () -> ()
    %62 = vector.shape_cast %61 : vector<2x8x8xf32> to vector<16x8xf32>
    %63 = vector.extract_strided_slice %7 {offsets = [16, 0], sizes = [8, 128], strides = [1, 1]} : vector<32x128xf32> to vector<8x128xf32>
    %cst_22 = arith.constant dense<0.000000e+00> : vector<16x128xf32>
    %64 = tpu.matmul %62, %63, %cst_22 {dimension_numbers = #tpu.dot_dimension_numbers<[1], [0], [0], [1], [0, 0, 1, 1], [], []>} : vector<16x8xf32>, vector<8x128xf32>, vector<16x128xf32> -> vector<16x128xf32>
    %65 = arith.addf %46, %64 : vector<16x128xf32>
    %66 = vector.extract_strided_slice %6 {offsets = [0, 0, 24], sizes = [2, 8, 8], strides = [1, 1, 1]} : vector<2x8x96xf32> to vector<2x8x8xf32>
    %67 = vector.extract_strided_slice %6 {offsets = [0, 0, 56], sizes = [2, 8, 8], strides = [1, 1, 1]} : vector<2x8x96xf32> to vector<2x8x8xf32>
    %68 = vector.extract_strided_slice %6 {offsets = [0, 0, 88], sizes = [2, 8, 8], strides = [1, 1, 1]} : vector<2x8x96xf32> to vector<2x8x8xf32>
    "tpu.trace_start"() <{level = 10 : i32, message = "bqd,bkd->bqk"}> : () -> ()
    %cst_23 = arith.constant dense<0.000000e+00> : vector<2x8x8xf32>
    %69 = tpu.matmul %66, %67, %cst_23 {dimension_numbers = #tpu.dot_dimension_numbers<[2], [2], [1], [1], [0, 0, 0, 1, 1, 1], [0], [0]>} : vector<2x8x8xf32>, vector<2x8x8xf32>, vector<2x8x8xf32> -> vector<2x8x8xf32>
    "tpu.trace_stop"() : () -> ()
    %cst_24 = arith.constant dense<0xFF800000> : vector<2x8xf32>
    %70 = vector.multi_reduction <maximumf>, %69, %cst_24 [2] : vector<2x8x8xf32> to vector<2x8xf32>
    %71 = vector.shape_cast %70 : vector<2x8xf32> to vector<2x8x1xf32>
    %72 = vector.broadcast %71 : vector<2x8x1xf32> to vector<2x8x8xf32>
    %73 = arith.subf %69, %72 : vector<2x8x8xf32>
    %74 = math.exp %73 : vector<2x8x8xf32>
    %cst_25 = arith.constant dense<0.000000e+00> : vector<2x8xf32>
    %75 = vector.multi_reduction <add>, %74, %cst_25 [2] : vector<2x8x8xf32> to vector<2x8xf32>
    %76 = vector.shape_cast %75 : vector<2x8xf32> to vector<2x8x1xf32>
    %77 = tpu.reciprocal %76 {approx = true} : vector<2x8x1xf32> -> vector<2x8x1xf32>
    %78 = vector.broadcast %77 : vector<2x8x1xf32> to vector<2x8x8xf32>
    %79 = arith.mulf %74, %78 : vector<2x8x8xf32>
    "tpu.trace_start"() <{level = 10 : i32, message = "bqk,bkd->bqd"}> : () -> ()
    %cst_26 = arith.constant dense<0.000000e+00> : vector<2x8x8xf32>
    %80 = tpu.matmul %79, %68, %cst_26 {dimension_numbers = #tpu.dot_dimension_numbers<[2], [1], [1], [2], [0, 0, 0, 1, 1, 2], [0], [0]>} : vector<2x8x8xf32>, vector<2x8x8xf32>, vector<2x8x8xf32> -> vector<2x8x8xf32>
    "tpu.trace_stop"() : () -> ()
    %81 = vector.shape_cast %80 : vector<2x8x8xf32> to vector<16x8xf32>
    %82 = vector.extract_strided_slice %7 {offsets = [24, 0], sizes = [8, 128], strides = [1, 1]} : vector<32x128xf32> to vector<8x128xf32>
    %cst_27 = arith.constant dense<0.000000e+00> : vector<16x128xf32>
    %83 = tpu.matmul %81, %82, %cst_27 {dimension_numbers = #tpu.dot_dimension_numbers<[1], [0], [0], [1], [0, 0, 1, 1], [], []>} : vector<16x8xf32>, vector<8x128xf32>, vector<16x128xf32> -> vector<16x128xf32>
    %84 = arith.addf %65, %83 : vector<16x128xf32>
    %c0_28 = arith.constant 0 : index
    %c0_29 = arith.constant 0 : index
    %85 = vector.load %arg5[%c0_28, %c0_29] : memref<1x128xf32, #tpu.memory_space<vmem>>, vector<1x128xf32>
    %86 = vector.broadcast %85 : vector<1x128xf32> to vector<16x128xf32>
    %87 = arith.addf %84, %86 : vector<16x128xf32>
    %c0_30 = arith.constant 0 : index
    %c0_31 = arith.constant 0 : index
    %88 = vector.load %arg6[%c0_30, %c0_31] : memref<16x128xf32, #tpu.memory_space<vmem>>, vector<16x128xf32>
    tpu.vector_store %arg6[%c0_30, %c0_31], %87 {strides = array<i32>} : memref<16x128xf32, #tpu.memory_space<vmem>>, vector<16x128xf32>,
    return
  }
  func.func @transform_0(%arg0: i32) -> (i32, i32) {
    %c0_i32 = arith.constant 0 : i32
    %c0_i32_0 = arith.constant 0 : i32
    %c0_i32_1 = arith.constant 0 : i32
    return %c0_i32, %c0_i32_0 : i32, i32
  }
  func.func @transform_1(%arg0: i32) -> (i32, i32) {
    %c0_i32 = arith.constant 0 : i32
    %c0_i32_0 = arith.constant 0 : i32
    %c0_i32_1 = arith.constant 0 : i32
    return %c0_i32, %c0_i32_0 : i32, i32
  }
  func.func @transform_2(%arg0: i32) -> (i32, i32) {
    %c0_i32 = arith.constant 0 : i32
    %c0_i32_0 = arith.constant 0 : i32
    %c0_i32_1 = arith.constant 0 : i32
    return %c0_i32, %c0_i32_0 : i32, i32
  }
  func.func @transform_3(%arg0: i32) -> (i32, i32) {
    %c0_i32 = arith.constant 0 : i32
    %c0_i32_0 = arith.constant 0 : i32
    %c0_i32_1 = arith.constant 0 : i32
    return %c0_i32, %c0_i32_0 : i32, i32
  }
  func.func @transform_4(%arg0: i32) -> (i32, i32) {
    %c0_i32 = arith.constant 0 : i32
    %c0_i32_0 = arith.constant 0 : i32
    %c0_i32_1 = arith.constant 0 : i32
    return %c0_i32, %c0_i32_0 : i32, i32
  }
  func.func @transform_5(%arg0: i32) -> (i32, i32) {
    %c0_i32 = arith.constant 0 : i32
    %c0_i32_0 = arith.constant 0 : i32
    %c0_i32_1 = arith.constant 0 : i32
    return %c0_i32, %c0_i32_0 : i32, i32
  }
}

</mosaic_0001>

<bundles_post_ra>
// kernel: tpu_custom_call.1
= control target key start
LH: loop header
LB: loop body
LE: loop exit
PB: predicated region body
PF: predicated region fallthrough
CT: control target
= control target key end

     0   :  { %10 = vsyncpa [#allocation3], 0  ;;  %s2449_s0 = inlined_call_operand.hbm [shape: f32[16,32], index: 0, kind: input, shape index: {}]   ;;  %s2450_s1 = inlined_call_operand.hbm [shape: f32[32,96], index: 1, kind: input, shape index: {}]   ;;  %s2451_s2 = inlined_call_operand.vmem [shape: f32[1,96], index: 2, kind: input, shape index: {}]   ;;  %s2452_s3 = inlined_call_operand.hbm [shape: f32[32,128], index: 3, kind: input, shape index: {}]   ;;  %s2453_s4 = inlined_call_operand.vmem [shape: f32[1,128], index: 4, kind: input, shape index: {}]   ;;  %s2454_s5 = inlined_call_operand.hbm [shape: f32[16,128], index: 5, kind: output, shape index: {}]  }
   0x1   :  { %11 = vsyncpa [#allocation6], 0 }
   0x2   :  { %12 = vsyncpa [#allocation4], 0  ;;  %s2193_s18 = smov [#allocation5]   ;;  %s2194_s20 = smov [#allocation2]  }
   0x3   :  { %s30_s19 = sshll.u32 %s2193_s18, 4  ;;  %s18_s21 = sshll.u32 %s2194_s20, 4  ;;  %s31_s19 = int_to_ptr.vmem [resolvable:$true] %s30_s19  ;;  %s2242_s21 = int_to_ptr.vmem [resolvable:$true] %s18_s21 }
   0x4   :  { %s2099_s24 = scalar_lea.hbm %s2450_s1, 512 }
   0x5   :  { %p2100_p0 = scmp.ne.s32.totalorder %s2450_s1, %s2099_s24  ;;  %p2103_p1 = scmp.lt.u32.totalorder %s2099_s24, %s2450_s1 }
   0x7   :  { %p2105_p2 = pnand %p2103_p1, %p2100_p0 }
   0x9   :  { %2108 = shalt.err (!%p2105_p2)
}
   0xa   :  { %s2109_s29 = scalar_lea.vmem %s31_s19, 512  ;;  %p2114_p4 = scmp.lt.s32.totalorder %s31_s19, %s31_s19 }
   0xb   :  { %p2110_p3 = scmp.ne.s32.totalorder %s31_s19, %s2109_s29  ;;  %p2115_p5 = scmp.lt.s32.totalorder %s2109_s29, %s2109_s29 }
   0xd   :  { %p2116_p6 = por %p2115_p5, %p2114_p4 }
   0xf   :  { %p2117_p7 = pnand %p2116_p6, %p2110_p3 }
  0x11   :  { %2120 = shalt.err (!%p2117_p7)
}
  0x12   :  { %s2195_s30 = smov 128   ;;  %s2196_s6 = smov 8  }
  0x13   :  { %36 = dma.hbm_to_vmem [thread:$0]  %s2450_s1, 512, %s31_s19, [#allocation6], %s2195_s30, %s2195_s30, %s2196_s6  }
  0x14   :  { %s2121_s11 = scalar_lea.hbm %s2449_s0, 256 }
  0x15   :  { %p2122_p8 = scmp.ne.s32.totalorder %s2449_s0, %s2121_s11  ;;  %p2125_p9 = scmp.lt.u32.totalorder %s2121_s11, %s2449_s0 }
  0x17   :  { %p2127_p10 = pnand %p2125_p9, %p2122_p8 }
  0x19   :  { %2130 = shalt.err (!%p2127_p10)
}
  0x1a   :  { %s2131_s16 = scalar_lea.vmem %s2242_s21, 256  ;;  %p2136_p12 = scmp.lt.s32.totalorder %s2242_s21, %s2242_s21 }
  0x1b   :  { %p2132_p11 = scmp.ne.s32.totalorder %s2242_s21, %s2131_s16  ;;  %p2137_p13 = scmp.lt.s32.totalorder %s2131_s16, %s2131_s16 }
  0x1d   :  { %p2138_p0 = por %p2137_p13, %p2136_p12 }
  0x1f   :  { %p2139_p1 = pnand %p2138_p0, %p2132_p11 }
  0x21   :  { %2142 = shalt.err (!%p2139_p1)
}
  0x22   :  { %24 = dma.hbm_to_vmem [thread:$0]  %s2449_s0, 256, %s2242_s21, [#allocation3], %s2195_s30, %s2195_s30, %s2196_s6  }
  0x23   :  { %s2197_s18 = smov [#allocation7]   ;;  %s2143_s23 = scalar_lea.hbm %s2452_s3, 512 }
  0x24   :  { %s44_s19 = sshll.u32 %s2197_s18, 4  ;;  %p2144_p2 = scmp.ne.s32.totalorder %s2452_s3, %s2143_s23  ;;  %s45_s19 = int_to_ptr.vmem [resolvable:$true] %s44_s19 }
  0x25   :  { %p2147_p3 = scmp.lt.u32.totalorder %s2143_s23, %s2452_s3 }
  0x27   :  { %p2149_p4 = pnand %p2147_p3, %p2144_p2 }
  0x29   :  { %2152 = shalt.err (!%p2149_p4)
}
  0x2a   :  { %s2153_s28 = scalar_lea.vmem %s45_s19, 512  ;;  %p2158_p6 = scmp.lt.s32.totalorder %s45_s19, %s45_s19 }
  0x2b   :  { %p2154_p5 = scmp.ne.s32.totalorder %s45_s19, %s2153_s28  ;;  %p2159_p7 = scmp.lt.s32.totalorder %s2153_s28, %s2153_s28 }
  0x2d   :  { %p2160_p8 = por %p2159_p7, %p2158_p6 }
  0x2f   :  { %p2161_p9 = pnand %p2160_p8, %p2154_p5 }
  0x31   :  { %2164 = shalt.err (!%p2161_p9)
}
  0x32   :  { %50 = dma.hbm_to_vmem [thread:$0]  %s2452_s3, 512, %s45_s19, [#allocation6], %s2195_s30, %s2195_s30, %s2196_s6  }
  0x33   :  { %2187 = dma.done.wait [#allocation3], 256  }
  0x34   :  { %2188 = vsyncadd [#allocation3], 4294967040 }
  0x35   :  { %2189 = dma.done.wait [#allocation6], 1024  }
  0x36   :  { %2190 = vsyncadd [#allocation6], 4294966272  ;;  %vm75_vm0 = vcmask 261120   ;;  %v64_v0 = vld [vmem:[#allocation5] sm:$0xff]  ;;  %v65_v1 = vld [vmem:[#allocation5 + $0x8] sm:$0xff]  ;;  %v2198_v8 = vmov 0.0  }
  0x37   :  { %v66_v2 = vld [vmem:[#allocation5 + $0x10] sm:$0xff]  ;;  %v2034_v3 = vpack.c.bf16 %v65_v1, %v64_v0  ;;  %v67_v4 = vld [vmem:[#allocation5 + $0x18] sm:$0xff]  ;;  %1934 = vmatprep.subr.mxu1 %v2198_v8  ;;  %vm2199_vm1 = vmmov 0   ;;  %s2200_s7 = smov 96   ;;  %vm164_vm2 = vcmask 64512   ;;  %s2202_s8 = smov 88  }
  0x38   :  { %v62_v5 = vld [vmem:[#allocation2] sm:$0xff]  ;;  %v2038_v6 = vpack.c.bf16 %v67_v4, %v66_v2  ;;  %v63_v7 = vld [vmem:[#allocation2 + $0x8] sm:$0xff]  ;;  %1936 = vmatprep.mubr.msk.f32.mxu1 %vm2199_vm1, %v2198_v8  ;;  %s2203_s9 = smov 120   ;;  %s2204_s10 = smov 56  }
  0x39   :  { %1931 = vmatprep.mubr.msk.f32.mxu0 %vm75_vm0, %v62_v5  ;;  %2035 = vmatprep.subr.bf16.mxu0 %v2034_v3  ;;  %v1837_v9 = vld [vmem:[%s2451_s2] ss:$0 sm:$0xff]  ;;  %s2201_s2 = smov 64   ;;  %s2205_s11 = smov 112  }
  0x3a   :  { %2037 = vmatpush3.bf16.msra.mxu0 %v2034_v3  ;;  %s2206_s12 = smov 80   ;;  %s2207_s13 = smov 48  }
  0x3b   :  { %2039 = vmatprep.subr.bf16.mxu0 %v2038_v6  ;;  %s2208_s14 = smov 72   ;;  %s2209_s15 = smov 104  }
  0x3c   :  { %s2210_s16 = smov 40   ;;  %s2211_s18 = smov [#allocation8]  }
  0x3d   :  { %s1824_s19 = sshll.u32 %s2211_s18, 4  ;;  %s1825_s19 = int_to_ptr.vmem [resolvable:$true] %s1824_s19 }
  0x3e   :  { %2041 = vmatpush3.bf16.msra.mxu0 %v2038_v6  ;;  %s2165_s20 = scalar_lea.vmem %s1825_s19, 256  ;;  %p2170_p11 = scmp.lt.s32.totalorder %s1825_s19, %s1825_s19 }
  0x3f   :  { %1954 = vmatprep.subr.mxu0 %v2198_v8  ;;  %p2166_p10 = scmp.ne.s32.totalorder %s1825_s19, %s2165_s20  ;;  %p2171_p12 = scmp.lt.s32.totalorder %s2165_s20, %s2165_s20 }
  0x41   :  { %1932 = vmatmul.mubr.msk.f32.vlgmr.msra.gmra.mrb[0].mxu0 %vm75_vm0, %v63_v7  ;;  %p2172_p13 = por %p2171_p12, %p2170_p11 }
  0x42   :  { %1956 = vmatprep.mubr.msk.f32.mxu0 %vm2199_vm1, %v2198_v8 }
  0x43   :  { %p2173_p0 = pnand %p2172_p13, %p2166_p10 }
 0x114   :  { %v1933_v10 = vpop.f32.mrb[0].mxu0 }
 0x115   :  { %v148_v11 = vpop.f32.mrb[1].mxu0  ;;  %v2306_v13 = vadd.f32 %v1933_v10, %v1837_v9 }
 0x116   :  { %v2303_v12 = vadd.f32 %v1837_v9, %v148_v11 }
 0x118   :  { %162 = vrot.lane.b32.xlu0 %v2303_v12, %s2200_s7 }
 0x11c   :  { %240 = vrot.lane.b32.xlu0 %v2306_v13, %s2200_s7 }
 0x18a   :  { %v163_v14 = vpop.permute.xlu0 %162 }
 0x18b   :  { %1935 = vmatpush3.xpose.msk.msra.mxu1 %vm164_vm2, %v163_v14 }
 0x18c   :  { %1939 = vmatprep.subr.mxu1 %v2198_v8 }
 0x18e   :  { %1937 = vmatmul.mubr.msk.f32.vlgmr.msra.gmra.mrb[0].mxu1 %vm164_vm2, %v2303_v12  ;;  %v241_v15 = vpop.permute.xlu0 %240 }
 0x18f   :  { %1940 = vmatpush3.xpose.msk.msra.mxu1 %vm164_vm2, %v241_v15  ;;  %1941 = vmatprep.mubr.msk.f32.mxu1 %vm2199_vm1, %v2198_v8 }
 0x190   :  { %1944 = vmatprep.subr.mxu1 %v2198_v8 }
 0x192   :  { %1942 = vmatmul.mubr.msk.f32.vlgmr.msra.gmra.mrb[2].mxu1 %vm164_vm2, %v2306_v13 }
 0x193   :  { %1946 = vmatprep.mubr.msk.f32.mxu1 %vm2199_vm1, %v2198_v8 }
 0x261   :  { %v235_v16 = vpop.f32.mrb[0].mxu1 }
 0x262   :  { %v1938_v17 = vpop.f32.mrb[1].mxu1  ;;  %v316_v18 = vsel %vm164_vm2, %v235_v16, -inf }
 0x263   :  { %317 = vmax.xlane.f32.xlu1 %v316_v18  ;;  %v157_v17 = vld [vmem:[#allocation7] sm:$0xff] }
 0x265   :  { %v312_v19 = vpop.f32.mrb[2].mxu1 }
 0x266   :  { %v1943_v20 = vpop.f32.mrb[3].mxu1  ;;  %v319_v21 = vsel %vm164_vm2, %v312_v19, -inf }
 0x267   :  { %320 = vmax.xlane.f32.xlu1 %v319_v21 }
 0x278   :  { %338 = vrot.lane.b32.xlu1 %v2303_v12, %s2201_s2 }
 0x27c   :  { %414 = vrot.lane.b32.xlu1 %v2306_v13, %s2201_s2 }
 0x280   :  { %570 = vrot.lane.b32.xlu1 %v2306_v13, %s2202_s8 }
 0x2f0   :  { %v318_v22 = vpop.xlane.xlu1 %317 }
 0x2f1   :  { %v322_v23 = vsub.f32 %v235_v16, %v318_v22  ;;  %v158_v16 = vld [vmem:[#allocation7 + $0x8] sm:$0xff] }
 0x2f3   :  { %v324_v24 = vmul.f32 1.442695, %v322_v23 }
 0x2f4   :  { %v321_v25 = vpop.xlane.xlu1 %320 }
 0x2f5   :  { %2067 = vpow2.f32 %v324_v24  ;;  %v323_v26 = vsub.f32 %v312_v19, %v321_v25 }
 0x2f7   :  { %v326_v27 = vmul.f32 1.442695, %v323_v26 }
 0x2f8   :  { %v339_v28 = vpop.permute.xlu1 %338 }
 0x2f9   :  { %2069 = vpow2.f32 %v326_v27  ;;  %1945 = vmatpush3.msra.mxu1 %v339_v28 }
 0x2fa   :  { %1949 = vmatprep.subr.mxu1 %v2198_v8 }
 0x2fc   :  { %v415_v33 = vpop.permute.xlu1 %414 }
 0x2ff   :  { %v2068_v29 = vpop.eup %2067 }
 0x300   :  { %v328_v30 = vsel %vm164_vm2, %v2068_v29, 0.0  ;;  %v571_v34 = vpop.permute.xlu1 %570 }
 0x301   :  { %329 = vadd.xlane.f32.xlu0 %v328_v30 }
 0x303   :  { %v2070_v31 = vpop.eup %2069 }
 0x304   :  { %v331_v32 = vsel %vm164_vm2, %v2070_v31, 0.0 }
 0x305   :  { %332 = vadd.xlane.f32.xlu1 %v331_v32 }
 0x316   :  { %568 = vrot.lane.b32.xlu1 %v2306_v13, %s2203_s9 }
 0x317   :  { %492 = vrot.lane.b32.xlu0 %v2303_v12, %s2202_s8 }
 0x31a   :  { %490 = vrot.lane.b32.xlu1 %v2303_v12, %s2203_s9 }
 0x38e   :  { %v330_v35 = vpop.xlane.xlu0 %329 }
 0x38f   :  { %2071 = vrcp.f32 %v330_v35 }
 0x392   :  { %v333_v36 = vpop.xlane.xlu1 %332  ;;  %v493_v37 = vpop.permute.xlu0 %492 }
 0x393   :  { %2073 = vrcp.f32 %v333_v36  ;;  %1955 = vmatpush3.xpose.msk.msra.mxu0 %vm164_vm2, %v493_v37 }
 0x394   :  { %1964 = vmatprep.subr.mxu0 %v2198_v8 }
 0x396   :  { %v569_v38 = vpop.permute.xlu1 %568 }
 0x399   :  { %v2072_v39 = vpop.eup %2071 }
 0x39a   :  { %v336_v40 = vmul.f32 %v2072_v39, %v2068_v29  ;;  %v491_v41 = vpop.permute.xlu1 %490 }
 0x39b   :  { %1957 = vmatmul.mubr.msk.f32.vlgmr.msra.gmra.mrb[2].mxu0 %vm164_vm2, %v491_v41 }
 0x39c   :  { %1947 = vmatmul.mubr.msk.f32.vlgmr.msra.gmra.mrb[4].mxu1 %vm164_vm2, %v336_v40  ;;  %1966 = vmatprep.mubr.msk.f32.mxu0 %vm2199_vm1, %v2198_v8  ;;  %v159_v40 = vld [vmem:[#allocation7 + $0x10] sm:$0xff] }
 0x39d   :  { %v2074_v42 = vpop.eup %2073  ;;  %1950 = vmatpush3.msra.mxu1 %v415_v33  ;;  %1951 = vmatprep.mubr.msk.f32.mxu1 %vm2199_vm1, %v2198_v8 }
 0x39e   :  { %v337_v43 = vmul.f32 %v2074_v42, %v2070_v31  ;;  %1959 = vmatprep.subr.mxu1 %v2198_v8 }
 0x3a0   :  { %1952 = vmatmul.mubr.msk.f32.vlgmr.msra.gmra.mrb[6].mxu1 %vm164_vm2, %v337_v43 }
 0x3a1   :  { %1961 = vmatprep.mubr.msk.f32.mxu1 %vm2199_vm1, %v2198_v8 }
 0x3a4   :  { %1960 = vmatpush3.xpose.msk.msra.mxu1 %vm164_vm2, %v571_v34 }
 0x3a5   :  { %1969 = vmatprep.subr.mxu1 %v2198_v8 }
 0x3a7   :  { %1962 = vmatmul.mubr.msk.f32.vlgmr.msra.gmra.mrb[8].mxu1 %vm164_vm2, %v569_v38 }
 0x3a8   :  { %1971 = vmatprep.mubr.msk.f32.mxu1 %vm2199_vm1, %v2198_v8 }
 0x46e   :  { %v564_v44 = vpop.f32.mrb[2].mxu0 }
 0x46f   :  { %v2349_v45 = vpop.f32.mrb[4].mxu1  ;;  %v1958_v46 = vpop.f32.mrb[3].mxu0  ;;  %v646_v53 = vsel %vm164_vm2, %v564_v44, -inf }
 0x470   :  { %v1948_v47 = vpop.f32.mrb[5].mxu1 }
 0x473   :  { %v2351_v48 = vpop.f32.mrb[6].mxu1 }
 0x474   :  { %v1953_v49 = vpop.f32.mrb[7].mxu1 }
 0x47a   :  { %v642_v50 = vpop.f32.mrb[8].mxu1 }
 0x47b   :  { %v1963_v51 = vpop.f32.mrb[9].mxu1  ;;  %v649_v52 = vsel %vm164_vm2, %v642_v50, -inf }
 0x47c   :  { %650 = vmax.xlane.f32.xlu1 %v649_v52 }
 0x48d   :  { %744 = vrot.lane.b32.xlu1 %v2306_v13, %s2204_s10 }
 0x491   :  { %982 = vrot.lane.b32.xlu1 %v2303_v12, %s2205_s11 }
 0x495   :  { %1062 = vrot.lane.b32.xlu1 %v2306_v13, %s2206_s12 }
 0x499   :  { %1060 = vrot.lane.b32.xlu1 %v2306_v13, %s2205_s11 }
 0x4bd   :  { %647 = vmax.xlane.f32.xlu1 %v646_v53 }
 0x509   :  { %v651_v54 = vpop.xlane.xlu1 %650 }
 0x50a   :  { %v653_v55 = vsub.f32 %v642_v50, %v651_v54 }
 0x50c   :  { %v656_v56 = vmul.f32 1.442695, %v653_v55 }
 0x50d   :  { %v745_v57 = vpop.permute.xlu1 %744 }
 0x50e   :  { %2075 = vpow2.f32 %v656_v56  ;;  %1970 = vmatpush3.msra.mxu1 %v745_v57 }
 0x50f   :  { %1984 = vmatprep.subr.mxu1 %v2198_v8 }
 0x511   :  { %v983_v60 = vpop.permute.xlu1 %982 }
 0x515   :  { %v1063_v61 = vpop.permute.xlu1 %1062 }
 0x518   :  { %v2076_v58 = vpop.eup %2075 }
 0x519   :  { %v661_v59 = vsel %vm164_vm2, %v2076_v58, 0.0  ;;  %v1061_v62 = vpop.permute.xlu1 %1060 }
 0x51a   :  { %662 = vadd.xlane.f32.xlu0 %v661_v59 }
 0x530   :  { %984 = vrot.lane.b32.xlu0 %v2303_v12, %s2206_s12 }
 0x54a   :  { %v648_v63 = vpop.xlane.xlu1 %647 }
 0x54b   :  { %v652_v0 = vsub.f32 %v564_v44, %v648_v63 }
 0x54d   :  { %v654_v1 = vmul.f32 1.442695, %v652_v0 }
 0x54f   :  { %2077 = vpow2.f32 %v654_v1 }
 0x559   :  { %v2078_v2 = vpop.eup %2077 }
 0x55a   :  { %v658_v3 = vsel %vm164_vm2, %v2078_v2, 0.0 }
 0x55b   :  { %659 = vadd.xlane.f32.xlu0 %v658_v3 }
 0x571   :  { %668 = vrot.lane.b32.xlu0 %v2303_v12, %s2204_s10 }
 0x575   :  { %1236 = vrot.lane.b32.xlu0 %v2306_v13, %s2207_s13 }
 0x579   :  { %1397 = vrot.lane.b32.xlu0 %v2303_v12, %s2208_s14 }
 0x57d   :  { %1475 = vrot.lane.b32.xlu0 %v2306_v13, %s2208_s14 }
 0x581   :  { %1395 = vrot.lane.b32.xlu0 %v2303_v12, %s2209_s15 }
 0x5a7   :  { %v663_v4 = vpop.xlane.xlu0 %662 }
 0x5a8   :  { %2079 = vrcp.f32 %v663_v4 }
 0x5ab   :  { %v985_v7 = vpop.permute.xlu0 %984 }
 0x5b2   :  { %v2080_v5 = vpop.eup %2079 }
 0x5b3   :  { %v667_v6 = vmul.f32 %v2080_v5, %v2076_v58 }
 0x5b5   :  { %1972 = vmatmul.mubr.msk.f32.vlgmr.msra.gmra.mrb[10].mxu1 %vm164_vm2, %v667_v6 }
 0x5b6   :  { %1985 = vmatpush3.xpose.msk.msra.mxu1 %vm164_vm2, %v985_v7  ;;  %1986 = vmatprep.mubr.msk.f32.mxu1 %vm2199_vm1, %v2198_v8 }
 0x5b7   :  { %1989 = vmatprep.subr.mxu1 %v2198_v8 }
 0x5b9   :  { %1987 = vmatmul.mubr.msk.f32.vlgmr.msra.gmra.mrb[12].mxu1 %vm164_vm2, %v983_v60 }
 0x5ba   :  { %1990 = vmatpush3.xpose.msk.msra.mxu1 %vm164_vm2, %v1063_v61  ;;  %1991 = vmatprep.mubr.msk.f32.mxu1 %vm2199_vm1, %v2198_v8 }
 0x5bb   :  { %1999 = vmatprep.subr.mxu1 %v2198_v8 }
 0x5bd   :  { %1992 = vmatmul.mubr.msk.f32.vlgmr.msra.gmra.mrb[14].mxu1 %vm164_vm2, %v1061_v62 }
 0x5be   :  { %2001 = vmatprep.mubr.msk.f32.mxu1 %vm2199_vm1, %v2198_v8 }
 0x5e8   :  { %v660_v9 = vpop.xlane.xlu0 %659 }
 0x5e9   :  { %2081 = vrcp.f32 %v660_v9 }
 0x5ec   :  { %v669_v10 = vpop.permute.xlu0 %668 }
 0x5ed   :  { %1965 = vmatpush3.msra.mxu0 %v669_v10 }
 0x5ee   :  { %1974 = vmatprep.subr.mxu0 %v158_v16 }
 0x5f0   :  { %v1237_v11 = vpop.permute.xlu0 %1236 }
 0x5f1   :  { %2000 = vmatpush3.msra.mxu1 %v1237_v11 }
 0x5f2   :  { %2009 = vmatprep.subr.mxu1 %v2198_v8 }
 0x5f3   :  { %v2082_v14 = vpop.eup %2081 }
 0x5f4   :  { %v666_v15 = vmul.f32 %v2082_v14, %v2078_v2  ;;  %v1398_v42 = vpop.permute.xlu0 %1397 }
 0x5f6   :  { %1967 = vmatmul.mubr.msk.f32.vlgmr.msra.gmra.mrb[4].mxu0 %vm164_vm2, %v666_v15 }
 0x5f7   :  { %1975 = vmatpush3.msra.mxu0 %v158_v16 }
 0x5f8   :  { %1979 = vmatprep.subr.mxu0 %v157_v17  ;;  %v1476_v46 = vpop.permute.xlu0 %1475 }
 0x688   :  { %v816_v18 = vpop.f32.mrb[10].mxu1 }
 0x689   :  { %v1973_v19 = vpop.f32.mrb[11].mxu1 }
 0x68c   :  { %v1056_v20 = vpop.f32.mrb[12].mxu1 }
 0x68d   :  { %v1988_v21 = vpop.f32.mrb[13].mxu1  ;;  %v1138_v22 = vsel %vm164_vm2, %v1056_v20, -inf }
 0x68e   :  { %1139 = vmax.xlane.f32.xlu1 %v1138_v22 }
 0x690   :  { %v1134_v23 = vpop.f32.mrb[14].mxu1 }
 0x691   :  { %v1993_v24 = vpop.f32.mrb[15].mxu1  ;;  %v1141_v25 = vsel %vm164_vm2, %v1134_v23, -inf }
 0x692   :  { %1142 = vmax.xlane.f32.xlu1 %v1141_v25 }
 0x6c9   :  { %v740_v26 = vpop.f32.mrb[4].mxu0 }
 0x6ca   :  { %v1968_v27 = vpop.f32.mrb[5].mxu0  ;;  %1976 = vmatprep.mubr.msk.f32.mxu0 %vm164_vm2, %v740_v26 }
 0x6cb   :  { %1977 = vmatmul.mubr.msk.f32.vlgmr.msra.gmra.mrb[6].mxu0 %vm164_vm2, %v816_v18 }
 0x6cc   :  { %1981 = vmatprep.mubr.msk.f32.mxu0 %vm164_vm2, %v2349_v45  ;;  %1980 = vmatpush3.msra.mxu0 %v157_v17 }
 0x6cd   :  { %1994 = vmatprep.subr.mxu0 %v2198_v8 }
 0x6d3   :  { %1982 = vmatmul.mubr.msk.f32.vlgmr.msra.gmra.mrb[6].mxu0 %vm164_vm2, %v2351_v48  ;;  %v1396_v48 = vpop.permute.xlu0 %1395 }
 0x6d4   :  { %1996 = vmatprep.mubr.msk.f32.mxu0 %vm2199_vm1, %v2198_v8 }
 0x71b   :  { %v1140_v28 = vpop.xlane.xlu1 %1139 }
 0x71c   :  { %v1144_v29 = vsub.f32 %v1056_v20, %v1140_v28 }
 0x71e   :  { %v1146_v30 = vmul.f32 1.442695, %v1144_v29 }
 0x71f   :  { %v1143_v31 = vpop.xlane.xlu1 %1142 }
 0x720   :  { %2083 = vpow2.f32 %v1146_v30  ;;  %v1145_v32 = vsub.f32 %v1134_v23, %v1143_v31 }
 0x722   :  { %v1148_v33 = vmul.f32 1.442695, %v1145_v32 }
 0x724   :  { %2085 = vpow2.f32 %v1148_v33 }
 0x72a   :  { %v2084_v34 = vpop.eup %2083 }
 0x72b   :  { %v1150_v35 = vsel %vm164_vm2, %v2084_v34, 0.0 }
 0x72c   :  { %1151 = vadd.xlane.f32.xlu1 %v1150_v35 }
 0x72e   :  { %v2086_v36 = vpop.eup %2085 }
 0x72f   :  { %v1153_v37 = vsel %vm164_vm2, %v2086_v36, 0.0 }
 0x730   :  { %1154 = vadd.xlane.f32.xlu1 %v1153_v37 }
 0x741   :  { %1160 = vrot.lane.b32.xlu1 %v2303_v12, %s2207_s13 }
 0x745   :  { %1473 = vrot.lane.b32.xlu1 %v2306_v13, %s2209_s15 }
 0x7b9   :  { %v1152_v38 = vpop.xlane.xlu1 %1151 }
 0x7ba   :  { %2087 = vrcp.f32 %v1152_v38 }
 0x7bd   :  { %v1155_v39 = vpop.xlane.xlu1 %1154 }
 0x7be   :  { %2089 = vrcp.f32 %v1155_v39 }
 0x7c1   :  { %v1161_v41 = vpop.permute.xlu1 %1160 }
 0x7c2   :  { %1995 = vmatpush3.msra.mxu0 %v1161_v41 }
 0x7c3   :  { %2004 = vmatprep.subr.mxu0 %v159_v40 }
 0x7c4   :  { %v2088_v43 = vpop.eup %2087 }
 0x7c5   :  { %v1158_v44 = vmul.f32 %v2088_v43, %v2084_v34  ;;  %v1474_v53 = vpop.permute.xlu1 %1473 }
 0x7c7   :  { %1997 = vmatmul.mubr.msk.f32.vlgmr.msra.gmra.mrb[8].mxu0 %vm164_vm2, %v1158_v44 }
 0x7c8   :  { %v2090_v45 = vpop.eup %2089  ;;  %2005 = vmatpush3.msra.mxu0 %v159_v40 }
 0x7c9   :  { %v1159_v47 = vmul.f32 %v2090_v45, %v2086_v36  ;;  %2014 = vmatprep.subr.mxu0 %v2198_v8 }
 0x7cb   :  { %2002 = vmatmul.mubr.msk.f32.vlgmr.msra.gmra.mrb[16].mxu1 %vm164_vm2, %v1159_v47 }
 0x7cc   :  { %2010 = vmatpush3.xpose.msk.msra.mxu1 %vm164_vm2, %v1398_v42  ;;  %2011 = vmatprep.mubr.msk.f32.mxu1 %vm2199_vm1, %v2198_v8 }
 0x7cd   :  { %2019 = vmatprep.subr.mxu1 %v2198_v8 }
 0x7cf   :  { %2012 = vmatmul.mubr.msk.f32.vlgmr.msra.gmra.mrb[18].mxu1 %vm164_vm2, %v1396_v48 }
 0x7d0   :  { %2021 = vmatprep.mubr.msk.f32.mxu1 %vm2199_vm1, %v2198_v8 }
 0x89a   :  { %v1232_v49 = vpop.f32.mrb[8].mxu0 }
 0x89b   :  { %v1998_v50 = vpop.f32.mrb[9].mxu0  ;;  %2006 = vmatprep.mubr.msk.f32.mxu0 %vm164_vm2, %v1232_v49 }
 0x89e   :  { %v1308_v51 = vpop.f32.mrb[16].mxu1 }
 0x89f   :  { %v2003_v52 = vpop.f32.mrb[17].mxu1  ;;  %2007 = vmatmul.mubr.msk.f32.vlgmr.msra.gmra.mrb[6].mxu0 %vm164_vm2, %v1308_v51 }
 0x8a0   :  { %2015 = vmatpush3.xpose.msk.msra.mxu0 %vm164_vm2, %v1476_v46  ;;  %2016 = vmatprep.mubr.msk.f32.mxu0 %vm2199_vm1, %v2198_v8 }
 0x8a1   :  { %2024 = vmatprep.subr.mxu0 %v2198_v8 }
 0x8a2   :  { %v1469_v54 = vpop.f32.mrb[18].mxu1 }
 0x8a3   :  { %v2013_v55 = vpop.f32.mrb[19].mxu1  ;;  %2017 = vmatmul.mubr.msk.f32.vlgmr.msra.gmra.mrb[10].mxu0 %vm164_vm2, %v1474_v53  ;;  %v1551_v56 = vsel %vm164_vm2, %v1469_v54, -inf }
 0x8a4   :  { %1552 = vmax.xlane.f32.xlu0 %v1551_v56  ;;  %2026 = vmatprep.mubr.msk.f32.mxu0 %vm2199_vm1, %v2198_v8 }
 0x931   :  { %v1553_v57 = vpop.xlane.xlu0 %1552 }
 0x932   :  { %v1557_v58 = vsub.f32 %v1469_v54, %v1553_v57 }
 0x934   :  { %v1559_v59 = vmul.f32 1.442695, %v1557_v58 }
 0x936   :  { %2091 = vpow2.f32 %v1559_v59 }
 0x940   :  { %v2092_v60 = vpop.eup %2091 }
 0x941   :  { %v1563_v61 = vsel %vm164_vm2, %v2092_v60, 0.0 }
 0x942   :  { %1564 = vadd.xlane.f32.xlu0 %v1563_v61 }
 0x976   :  { %v1547_v62 = vpop.f32.mrb[10].mxu0 }
 0x977   :  { %v2018_v63 = vpop.f32.mrb[11].mxu0  ;;  %v1554_v0 = vsel %vm164_vm2, %v1547_v62, -inf }
 0x978   :  { %1555 = vmax.xlane.f32.xlu1 %v1554_v0 }
 0x989   :  { %1573 = vrot.lane.b32.xlu1 %v2303_v12, %s2210_s16  ;;  %v160_v12 = vld [vmem:[#allocation7 + $0x18] sm:$0xff] }
 0x9cf   :  { %v1565_v1 = vpop.xlane.xlu0 %1564 }
 0x9d0   :  { %2093 = vrcp.f32 %v1565_v1 }
 0x9da   :  { %v2094_v8 = vpop.eup %2093 }
 0x9db   :  { %v1571_v5 = vmul.f32 %v2094_v8, %v2092_v60 }
 0xa05   :  { %v1556_v2 = vpop.xlane.xlu1 %1555 }
 0xa06   :  { %v1558_v3 = vsub.f32 %v1547_v62, %v1556_v2 }
 0xa08   :  { %v1561_v4 = vmul.f32 1.442695, %v1558_v3 }
 0xa09   :  { %v1574_v6 = vpop.permute.xlu1 %1573 }
 0xa0a   :  { %2095 = vpow2.f32 %v1561_v4  ;;  %2020 = vmatpush3.msra.mxu1 %v1574_v6 }
 0xa0b   :  { %2022 = vmatmul.mubr.msk.f32.vlgmr.msra.gmra.mrb[20].mxu1 %vm164_vm2, %v1571_v5 }
 0xa14   :  { %v2096_v7 = vpop.eup %2095 }
 0xa15   :  { %v1566_v9 = vsel %vm164_vm2, %v2096_v7, 0.0 }
 0xa16   :  { %1567 = vadd.xlane.f32.xlu0 %v1566_v9 }
 0xa2c   :  { %1649 = vrot.lane.b32.xlu0 %v2306_v13, %s2210_s16  ;;  %v1872_v13 = vld [vmem:[%s2453_s4] ss:$0 sm:$0xff] }
 0xaa3   :  { %v1568_v10 = vpop.xlane.xlu0 %1567 }
 0xaa4   :  { %2097 = vrcp.f32 %v1568_v10 }
 0xaa7   :  { %v1650_v11 = vpop.permute.xlu0 %1649 }
 0xaa8   :  { %2025 = vmatpush3.msra.mxu0 %v1650_v11 }
 0xaa9   :  { %2029 = vmatprep.subr.mxu0 %v160_v12 }
 0xaae   :  { %v2098_v14 = vpop.eup %2097 }
 0xaaf   :  { %v1572_v15 = vmul.f32 %v2098_v14, %v2096_v7 }
 0xab1   :  { %2027 = vmatmul.mubr.msk.f32.vlgmr.msra.gmra.mrb[12].mxu0 %vm164_vm2, %v1572_v15 }
 0xab2   :  { %2030 = vmatpush3.msra.mxu0 %v160_v12 }
 0xade   :  { %v1645_v16 = vpop.f32.mrb[20].mxu1 }
 0xadf   :  { %v2023_v17 = vpop.f32.mrb[21].mxu1  ;;  %2031 = vmatprep.mubr.msk.f32.mxu0 %vm164_vm2, %v1645_v16 }
 0xb84   :  { %v1721_v18 = vpop.f32.mrb[12].mxu0 }
 0xb85   :  { %v2028_v19 = vpop.f32.mrb[13].mxu0  ;;  %2032 = vmatmul.mubr.msk.f32.vlgmr.msra.gmra.mrb[6].mxu0 %vm164_vm2, %v1721_v18 }
 0xc58   :  { %v2033_v20 = vpop.f32.mrb[6].mxu0 }
 0xc59   :  { %v1816_v21 = vadd.f32 %v2033_v20, %v1872_v13  ;;  %v1797_v22 = vpop.f32.mrb[7].mxu0 }
 0xc5a   :  { %v1815_v23 = vadd.f32 %v1872_v13, %v1797_v22 }
 0xc5b   :  { %1818 = vst [vmem:[#allocation8 + $0x8] sm:$0xff] %v1816_v21 }
 0xc5c   :  { %1817 = vst [vmem:[#allocation8] sm:$0xff] %v1815_v23 }
 0xc5d   :  { %2176 = shalt.err (!%p2173_p0)
}
 0xc5e   :  { %s2177_s4 = scalar_lea.hbm %s2454_s5, 256 }
 0xc5f   :  { %p2178_p1 = scmp.ne.s32.totalorder %s2454_s5, %s2177_s4  ;;  %p2181_p2 = scmp.lt.u32.totalorder %s2177_s4, %s2454_s5 }
 0xc61   :  { %p2183_p3 = pnand %p2181_p2, %p2178_p1 }
 0xc63   :  { %2186 = shalt.err (!%p2183_p3)
}
 0xc64   :  { %1830 = dma.vmem_to_hbm [thread:$0]  %s1825_s19, 256, %s2454_s5, [#allocation4], %s2195_s30, %s2195_s30, %s2196_s6  }
 0xc65   :  { %2191 = dma.done.wait [#allocation4], 256  }
 0xc66   :  { %2192 = vsyncadd [#allocation4], 4294967040 }
 0xc67   :  { %1834 = vsyncpa [#allocation3], 1 }
 0xc68   :  { %1835 = vsyncpa [#allocation6], 1 }
 0xc69   :  { %1836 = vsyncpa [#allocation4], 1 }

</bundles_post_ra>
